<compile_context>
chip_gen: v6e
topology: v6e:2x2x1
jax: 0.10.0
libtpu: 0.0.40
codegen_flags: <defaults>
</compile_context>

<pallas_src>
import math
from functools import partial

import numpy as np
import jax
import jax.numpy as jnp
from jax.experimental import pallas as pl
from jax.experimental.pallas import tpu as pltpu


# ---------------------------------------------------------------------------
# 2D sincos positional embedding (setup-time glue, mirrors diffusers impl).
# ---------------------------------------------------------------------------
def _get_1d_sincos_pos_embed_from_grid(embed_dim, pos):
    omega = np.arange(embed_dim // 2, dtype=np.float64)
    omega /= embed_dim / 2.0
    omega = 1.0 / 10000 ** omega
    pos = pos.reshape(-1)
    out = np.einsum("m,d->md", pos, omega)
    return np.concatenate([np.sin(out), np.cos(out)], axis=1)


def get_2d_sincos_pos_embed(embed_dim, grid_size, base_size=16, interpolation_scale=1.0):
    grid_h = np.arange(grid_size, dtype=np.float64) / (grid_size / base_size) / interpolation_scale
    grid_w = np.arange(grid_size, dtype=np.float64) / (grid_size / base_size) / interpolation_scale
    grid = np.meshgrid(grid_w, grid_h)  # w goes first (diffusers convention)
    grid = np.stack(grid, axis=0).reshape([2, 1, grid_size, grid_size])
    emb_h = _get_1d_sincos_pos_embed_from_grid(embed_dim // 2, grid[0])
    emb_w = _get_1d_sincos_pos_embed_from_grid(embed_dim // 2, grid[1])
    return np.concatenate([emb_h, emb_w], axis=1)  # (grid_size**2, embed_dim)


# ---------------------------------------------------------------------------
# Pallas kernel:  (TN, K) @ (K, E)  +  (pos_embed + bias)(TN, E)
# ---------------------------------------------------------------------------
def _patch_embed_kernel(x_ref, w_ref, pe_ref, o_ref):
    # x_ref : (1, TN, K) patches, one batch element x one N-tile
    # w_ref : (K, E)     folded conv weight (same block every step -> resident)
    # pe_ref: (TN, E)    cropped pos-embed with conv bias folded in
    #                    (block index constant across the inner batch axis ->
    #                     Pallas skips the redundant DMA)
    # o_ref : (1, TN, E) lane-dense output (E multiple of 128 -> unmasked vst)
    y = jnp.dot(x_ref[0], w_ref[...], preferred_element_type=jnp.float32)
    o_ref[0] = (y + pe_ref[...].astype(jnp.float32)).astype(o_ref.dtype)


def _choose_n_tile(N, per_row_bytes, fixed_bytes, *, vmem_budget=12 << 20,
                   cap_rows=1024, align=8, want_tiles=1):
    """Pick the row tile along N.

    Constraints: multiple of `align` (8 for f32, 16 for bf16 sublane packing),
    double-buffered streams fit `vmem_budget` (sized for v5e's 16 MiB default
    scoped VMEM), capped at `cap_rows` (mem-bound: ~85% of roofline already at
    512 rows), and -- when want_tiles > 1 -- small enough that the grid has at
    least 2 steps so v7x's second TensorCore is not idle.
    Prefers a divisor of N; otherwise the caller pads N up to a tile multiple.
    """
    cap = (vmem_budget - fixed_bytes) // max(1, per_row_bytes)
    cap = max(align, min(cap, cap_rows))
    if want_tiles > 1 and N >= 2 * align:
        cap = min(cap, max(align, N // want_tiles))
    cap = max(align, (cap // align) * align)
    t = min(cap, (N // align) * align)
    while t >= align:
        if N % t == 0:
            return t
        t -= align
    # No aligned divisor <= cap.  Small N: take the full axis (full-array-dim
    # blocks are always legal).  Large awkward N: return cap; wrapper pads.
    if N <= cap:
        return N
    return cap


def patch_embed_pallas(patches, weight_ke, pe_bias, out_dtype):
    """patches: (B, N, K); weight_ke: (K, E); pe_bias: (N, E) = pos_embed + bias."""
    B, N, K = patches.shape
    E = weight_ke.shape[1]

    x_b = patches.dtype.itemsize
    pe_b = pe_bias.dtype.itemsize
    o_b = jnp.dtype(out_dtype).itemsize
    per_row = 2 * (K * x_b + E * pe_b + E * o_b)        # double-buffered streams
    fixed = 2 * K * E * weight_ke.dtype.itemsize        # resident weight block
    align = 16 if min(x_b, pe_b) < 4 else 8             # bf16 packs 16 sublanes/vreg
    tn = _choose_n_tile(N, per_row, fixed, align=align,
                        want_tiles=2 if B == 1 else 1)

    n_tiles = pl.cdiv(N, tn)
    n_pad = n_tiles * tn
    if n_pad != N:
        patches = jnp.pad(patches, ((0, 0), (0, n_pad - N), (0, 0)))
        pe_bias = jnp.pad(pe_bias, ((0, n_pad - N), (0, 0)))

    out = pl.pallas_call(
        _patch_embed_kernel,
        out_shape=jax.ShapeDtypeStruct((B, n_pad, E), out_dtype),
        grid_spec=pltpu.PrefetchScalarGridSpec(
            num_scalar_prefetch=0,
            grid=(n_tiles, B),   # N-tile outer, batch inner -> pe block revisited
            in_specs=[
                pl.BlockSpec((1, tn, K), lambda j, b: (b, j, 0)),
                pl.BlockSpec((K, E), lambda j, b: (0, 0)),
                pl.BlockSpec((tn, E), lambda j, b: (j, 0)),
            ],
            out_specs=pl.BlockSpec((1, tn, E), lambda j, b: (b, j, 0)),
        ),
        compiler_params=pltpu.CompilerParams(
            dimension_semantics=("parallel", "parallel")),
    )(patches, weight_ke, pe_bias)

    if n_pad != N:
        out = out[:, :N, :]
    return out


@partial(jax.jit, static_argnames=("patch_size",))
def _patchify_and_embed(latent, w_ke, pe_bias, *, patch_size):
    """Jitted: NCHW unfold (single fused transpose) + Pallas matmul-add."""
    B, C, H, W = latent.shape
    p = patch_size
    x = latent.reshape(B, C, H // p, p, W // p, p)
    x = jnp.transpose(x, (0, 2, 4, 1, 3, 5)).reshape(B, (H // p) * (W // p), C * p * p)
    x = x.astype(w_ke.dtype)   # cast at the producer; fuses into the transpose
    return patch_embed_pallas(x, w_ke, pe_bias, out_dtype=latent.dtype)


# ---------------------------------------------------------------------------
# JAX/Pallas port of OmniGenPatchEmbed
# ---------------------------------------------------------------------------
class OmniGenPatchEmbedPallas:
    def __init__(
        self,
        patch_size: int = 2,
        in_channels: int = 4,
        embed_dim: int = 128,
        bias: bool = True,
        interpolation_scale: float = 1.0,
        pos_embed_max_size: int = 16,
        base_size: int = 8,
        matmul_dtype=None,  # e.g. jnp.bfloat16: half-bandwidth x/w/pe streams
        key=None,
    ):
        assert bias, "bias=True assumed (matches default)"
        self.patch_size = patch_size
        self.in_channels = in_channels
        self.embed_dim = embed_dim
        self.pos_embed_max_size = pos_embed_max_size
        self.matmul_dtype = matmul_dtype

        # Deterministic conv parameter init (PyTorch-style uniform bounds).
        k = key if key is not None else jax.random.PRNGKey(0)
        k0, k1, k2, k3 = jax.random.split(k, 4)
        fan_in = in_channels * patch_size * patch_size
        bound = 1.0 / math.sqrt(fan_in)
        wshape = (embed_dim, in_channels, patch_size, patch_size)  # OIHW like nn.Conv2d
        self.output_image_proj_w = jax.random.uniform(k0, wshape, jnp.float32, -bound, bound)
        self.output_image_proj_b = jax.random.uniform(k1, (embed_dim,), jnp.float32, -bound, bound)
        self.input_image_proj_w = jax.random.uniform(k2, wshape, jnp.float32, -bound, bound)
        self.input_image_proj_b = jax.random.uniform(k3, (embed_dim,), jnp.float32, -bound, bound)

        pe = get_2d_sincos_pos_embed(
            embed_dim, pos_embed_max_size, base_size=base_size,
            interpolation_scale=interpolation_scale,
        )
        self.pos_embed = jnp.asarray(pe, dtype=jnp.float32)  # (max*max, E)

        # Pre-fold conv weights to (K, E) once (cached; no per-call transpose).
        K = in_channels * patch_size * patch_size
        w_out_ke = self.output_image_proj_w.reshape(embed_dim, K).T
        w_in_ke = self.input_image_proj_w.reshape(embed_dim, K).T
        if matmul_dtype is not None:
            w_out_ke = w_out_ke.astype(matmul_dtype)
            w_in_ke = w_in_ke.astype(matmul_dtype)
        self._w_ke = {True: w_in_ke, False: w_out_ke}
        self._bias = {True: self.input_image_proj_b, False: self.output_image_proj_b}
        self._pe_cache = {}  # (h, w, is_input_image) -> (N, E) pos_embed + bias

    # ---- helpers ---------------------------------------------------------
    def cropped_pos_embed(self, height, width):
        h = height // self.patch_size
        w = width // self.patch_size
        if h > self.pos_embed_max_size or w > self.pos_embed_max_size:
            raise ValueError("spatial size exceeds pos_embed_max_size")
        top = (self.pos_embed_max_size - h) // 2
        left = (self.pos_embed_max_size - w) // 2
        pe = self.pos_embed.reshape(self.pos_embed_max_size, self.pos_embed_max_size, -1)
        pe = pe[top:top + h, left:left + w, :]
        return pe.reshape(h * w, -1)  # (N, E)

    def _pe_plus_bias(self, height, width, is_input_image):
        key = (height, width, bool(is_input_image))
        pe = self._pe_cache.get(key)
        if pe is None:
            pe = self.cropped_pos_embed(height, width) + self._bias[bool(is_input_image)][None, :]
            if self.matmul_dtype is not None:
                # Narrow the dominant pe HBM stream; kernel upcasts before the add.
                pe = pe.astype(self.matmul_dtype)
            self._pe_cache[key] = pe
        return pe

    def _embed_one(self, latent, is_input_image):
        H, W = latent.shape[-2:]
        w_ke = self._w_ke[bool(is_input_image)]
        pe = self._pe_plus_bias(H, W, is_input_image)
        return _patchify_and_embed(latent, w_ke, pe, patch_size=self.patch_size)

    # ---- forward ---------------------------------------------------------
    def __call__(self, latent, is_input_image: bool, padding_latent=None):
        if isinstance(latent, list):
            if padding_latent is None:
                padding_latent = [None] * len(latent)
            outs = []
            for sub_latent, padding in zip(latent, padding_latent):
                sub = self._embed_one(sub_latent, is_input_image)
                if padding is not None:
                    sub = jnp.concatenate([sub, padding], axis=-2)
                outs.append(sub)
            return outs
        return self._embed_one(latent, is_input_image)


# ---------------------------------------------------------------------------
# Pure-JAX reference (strided conv, f32-exact) for correctness check.
# ---------------------------------------------------------------------------
def _reference(module, latent, is_input_image):
    w = module.input_image_proj_w if is_input_image else module.output_image_proj_w
    b = module.input_image_proj_b if is_input_image else module.output_image_proj_b
    p = module.patch_size
    y = jax.lax.conv_general_dilated(
        latent, w, window_strides=(p, p), padding="VALID",
        dimension_numbers=("NCHW", "OIHW", "NCHW"),
        precision=jax.lax.Precision.HIGHEST,
    )  # (B, E, H/p, W/p)
    y = y + b.reshape(1, -1, 1, 1)
    B, E, Hp, Wp = y.shape
    y = y.reshape(B, E, Hp * Wp).transpose(0, 2, 1)  # (B, N, E)
    H, W = latent.shape[-2:]
    return y + module.cropped_pos_embed(H, W)[None]


if __name__ == "__main__":
    key = jax.random.PRNGKey(0)
    k_param, k_x = jax.random.split(key)

    module = OmniGenPatchEmbedPallas(
        patch_size=2, in_channels=4, embed_dim=128,
        interpolation_scale=1.0, pos_embed_max_size=16, base_size=8,
        key=k_param,
    )

    latent = jax.random.normal(k_x, (2, 4, 16, 16), dtype=jnp.float32)

    # f32 path (matches PyTorch semantics, tight tolerance).
    out = jax.block_until_ready(module(latent, is_input_image=False))
    assert out.shape == (2, 64, 128), out.shape
    out_in = jax.block_until_ready(module(latent, is_input_image=True))

    ref = _reference(module, latent, is_input_image=False)
    ref_in = _reference(module, latent, is_input_image=True)
    np.testing.assert_allclose(np.asarray(out), np.asarray(ref), atol=1e-4, rtol=1e-4)
    np.testing.assert_allclose(np.asarray(out_in), np.asarray(ref_in), atol=1e-4, rtol=1e-4)

    # bf16 half-bandwidth path (x/w/pe streams narrowed, f32 accumulation &
    # f32 output), looser tolerance.
    module_bf16 = OmniGenPatchEmbedPallas(
        patch_size=2, in_channels=4, embed_dim=128,
        interpolation_scale=1.0, pos_embed_max_size=16, base_size=8,
        matmul_dtype=jnp.bfloat16, key=k_param,
    )
    out_bf16 = jax.block_until_ready(module_bf16(latent, is_input_image=False))
    np.testing.assert_allclose(np.asarray(out_bf16), np.asarray(ref), atol=5e-2, rtol=5e-2)

    # B == 1 path exercises the >=2-tile split (v7x megacore) of the N axis.
    out_b1 = jax.block_until_ready(module(latent[:1], is_input_image=False))
    np.testing.assert_allclose(np.asarray(out_b1), np.asarray(ref[:1]), atol=1e-4, rtol=1e-4)

    # list input path (covers the padding_latent branch with None paddings).
    out_list = module([latent, latent[:1]], is_input_image=False)
    jax.block_until_ready(out_list)
    assert out_list[0].shape == (2, 64, 128) and out_list[1].shape == (1, 64, 128)

    print("KERNEL_OK")
</pallas_src>

<mosaic_0001>
module attributes {stable_mosaic.version = 11 : i64} {
  func.func @_patch_embed_kernel(%arg0: i32, %arg1: i32, %arg2: memref<1x64x16xf32, #tpu.memory_space<vmem>>, %arg3: memref<16x128xf32, #tpu.memory_space<vmem>>, %arg4: memref<64x128xf32, #tpu.memory_space<vmem>>, %arg5: memref<1x64x128xf32, #tpu.memory_space<vmem>>) attributes {dimension_semantics = [#tpu.dimension_semantics<parallel>, #tpu.dimension_semantics<parallel>], iteration_bounds = array<i64: 1, 2>, scalar_prefetch = 0 : i64, scratch_operands = 0 : i64, tpu.core_type = #tpu.core_type<tc>, window_params = [{transform_indices = @transform_0, window_bounds = array<i64: 1, 64, 16>}, {pipeline_mode = #tpu.pipeline_mode<synchronous>, transform_indices = @transform_1, window_bounds = array<i64: 16, 128>}, {transform_indices = @transform_2, window_bounds = array<i64: 64, 128>}, {transform_indices = @transform_3, window_bounds = array<i64: 1, 64, 128>}]} {
    %c0 = arith.constant 0 : index
    %c0_0 = arith.constant 0 : index
    %c0_1 = arith.constant 0 : index
    %0 = vector.load %arg2[%c0, %c0_0, %c0_1] : memref<1x64x16xf32, #tpu.memory_space<vmem>>, vector<1x64x16xf32>
    %1 = vector.shape_cast %0 : vector<1x64x16xf32> to vector<64x16xf32>
    %c0_2 = arith.constant 0 : index
    %c0_3 = arith.constant 0 : index
    %2 = vector.load %arg3[%c0_2, %c0_3] : memref<16x128xf32, #tpu.memory_space<vmem>>, vector<16x128xf32>
    %cst = arith.constant dense<0.000000e+00> : vector<64x128xf32>
    %3 = tpu.matmul %1, %2, %cst {dimension_numbers = #tpu.dot_dimension_numbers<[1], [0], [0], [1], [0, 0, 1, 1], [], []>} : vector<64x16xf32>, vector<16x128xf32>, vector<64x128xf32> -> vector<64x128xf32>
    %c0_4 = arith.constant 0 : index
    %c0_5 = arith.constant 0 : index
    %4 = vector.load %arg4[%c0_4, %c0_5] : memref<64x128xf32, #tpu.memory_space<vmem>>, vector<64x128xf32>
    %5 = arith.addf %3, %4 : vector<64x128xf32>
    %c0_6 = arith.constant 0 : index
    %c0_7 = arith.constant 0 : index
    %c0_8 = arith.constant 0 : index
    %6 = vector.load %arg5[%c0_6, %c0_7, %c0_8] : memref<1x64x128xf32, #tpu.memory_space<vmem>>, vector<1x64x128xf32>
    %7 = vector.shape_cast %6 : vector<1x64x128xf32> to vector<64x128xf32>
    %8 = vector.shape_cast %5 : vector<64x128xf32> to vector<1x64x128xf32>
    tpu.vector_store %arg5[%c0_6, %c0_7, %c0_8], %8 {strides = array<i32>} : memref<1x64x128xf32, #tpu.memory_space<vmem>>, vector<1x64x128xf32>,
    return
  }
  func.func @transform_0(%arg0: i32, %arg1: i32) -> (i32, i32, i32) {
    %c0_i32 = arith.constant 0 : i32
    %c0_i32_0 = arith.constant 0 : i32
    return %arg1, %arg0, %c0_i32 : i32, i32, i32
  }
  func.func @transform_1(%arg0: i32, %arg1: i32) -> (i32, i32) {
    %c0_i32 = arith.constant 0 : i32
    %c0_i32_0 = arith.constant 0 : i32
    %c0_i32_1 = arith.constant 0 : i32
    return %c0_i32, %c0_i32_0 : i32, i32
  }
  func.func @transform_2(%arg0: i32, %arg1: i32) -> (i32, i32) {
    %c0_i32 = arith.constant 0 : i32
    %c0_i32_0 = arith.constant 0 : i32
    return %arg0, %c0_i32 : i32, i32
  }
  func.func @transform_3(%arg0: i32, %arg1: i32) -> (i32, i32, i32) {
    %c0_i32 = arith.constant 0 : i32
    %c0_i32_0 = arith.constant 0 : i32
    return %arg1, %arg0, %c0_i32 : i32, i32, i32
  }
}

</mosaic_0001>

<bundles_post_ra>
// kernel: _patchify_and_embed.1
= control target key start
LH: loop header
LB: loop body
LE: loop exit
PB: predicated region body
PF: predicated region fallthrough
CT: control target
= control target key end

     0   :  { %8 = vsyncpa [#allocation3], 0  ;;  %s856_s0 = inlined_call_operand.vmem [shape: f32[2,64,16], index: 0, kind: input, shape index: {}]   ;;  %s857_s1 = inlined_call_operand.vmem [shape: f32[16,128], index: 1, kind: input, shape index: {}]   ;;  %s858_s2 = inlined_call_operand.vmem [shape: f32[64,128], index: 2, kind: input, shape index: {}]   ;;  %s859_s3 = inlined_call_operand.hbm [shape: f32[2,64,128], index: 3, kind: output, shape index: {}]  }
   0x1   :  { %10 = vsyncpa [#allocation3 + $0x1], 0  ;;  %s700_s12 = smov 0   ;;  %s702_s13 = smov 0  }
   0x2   :  { %s704_s14 = smov 0   ;;  %s706_s15 = smov 0  }
   0x3   :  { %s708_s16 = smov 0   ;;  %s710_s17 = smov 0  }
   0x4 LB: > { %s488_s18 = sadd.s32 4294967295, %s675_s17   ;;  %s489_s19 = sadd.s32 4294967294, %s675_s17   ;;  %s675_s17 = sphi %s710_s17, %s16_s17   ;;  %s671_s16 = sphi %s708_s16, %s866_s16   ;;  %s667_s15 = sphi %s706_s15, %s865_s15   ;;  %s663_s14 = sphi %s704_s14, %s864_s14   ;;  %s659_s13 = sphi %s702_s13, %s863_s13   ;;  %s655_s12 = sphi %s700_s12, %s862_s12  }
   0x5   : > { %s25_s20 = sadd.s32 1, %s671_s16  ;;  %s112_s21 = sadd.s32 1, %s663_s14 }
   0x6   : > { %p26_p0 = scmp.ge.s32.totalorder %s25_s20, 2  ;;  %p122_p1 = scmp.ne.s32.totalorder %s663_s14, %s659_s13 }
   0x7   : > { %p123_p2 = scmp.eq.s32.totalorder %s488_s18, 1  ;;  %p128_p3 = scmp.ne.s32.totalorder %s659_s13, %s655_s12 }
   0x8   : > { %s868_s20 = smov (%p26_p0, %s25_s20), 0  ;;  %p129_p5 = scmp.eq.s32.totalorder %s489_s19, 1 }
   0x9   : > { %p740_p4 = por %p123_p2, %p122_p1  ;;  %s107_s23 = ssub.s32 %s671_s16, %s868_s20 }
   0xa   : > { %p493_p6 = scmp.ge.s32.totalorder %s675_s17, 1  ;;  %p110_p7 = scmp.eq.s32.totalorder %s107_s23, 0 }
   0xb   : > { %p747_p8 = por %p129_p5, %p128_p3  ;;  %p172_p9 = scmp.lt.s32.totalorder %s675_s17, 3 }
   0xc   : > { %s753_s25 = scalar_select %p110_p7, %s663_s14, %s112_s21  }
   0xd   : > { %p173_p10 = pnand %p493_p6, %p172_p9 }
   0xe   : > { %p206_p11 = scmp.lt.s32.totalorder (!%p173_p10), %s667_s15, 1  ;;  %s202_s8 = sand.u32 (!%p173_p10), 1, %s659_s13  }
   0xf   : > { %176 = sbr.rel (%p173_p10) target bundleno = 242 (0xf2), region = 32  ;;  %s494_s9 = sshll.u32 (!%p173_p10), %s202_s8, 6 }
  0x10   : > { %s204_s5 = scalar_lea.vmem (!%p173_p10), [#allocation2], %s494_s9  ;;  %s511_s6 = sshll.u32 (!%p173_p10), %s667_s15, 10 }
  0x11   : > { %s805_s21 = scalar_lea.hbm (!%p173_p10), %s859_s3, %s511_s6  ;;  %s811_s23 = scalar_lea.sflag (!%p173_p10), [#allocation3], %s202_s8 }
  0x12   : > { %s677_s27 = smov (!%p173_p10), [#allocation2]  }
  0x13   : > { %s603_s28 = sshll.u32 (!%p173_p10), %s677_s27, 4  ;;  %s604_s28 = int_to_ptr.vmem [resolvable:$false] %s603_s28 }
  0x14   : > { %v231_v0 = vld [vmem:[%s857_s1 + $0x8] sm:$0xff]  ;;  %v230_v1 = vld [vmem:[%s857_s1] sm:$0xff]  ;;  %s207_s30 = scalar_select %p206_p11, %s667_s15, 1  ;;  %vm240_vm0 = vcmask 130048   ;;  %v235_v20 = vld [vmem:[%s858_s2 + $0x18] sm:$0xff] }
  0x15   : > { %522 = vmatprep.subr.mxu0 %v231_v0  ;;  %538 = vmatprep.subr.mxu1 %v231_v0  ;;  %v233_v10 = vld [vmem:[%s858_s2 + $0x8] sm:$0xff]  ;;  %v232_v14 = vld [vmem:[%s858_s2] sm:$0xff]  ;;  %v239_v21 = vld [vmem:[%s858_s2 + $0x38] sm:$0xff]  ;;  %s605_s29 = scalar_lea.vmem %s604_s28, 2048 }
  0x16   : > { %523 = vmatpush3.msra.mxu0 %v231_v0  ;;  %540 = vmatpush3.msra.mxu1 %v231_v0  ;;  %s510_s4 = sshll.u32 %s207_s30, 6  ;;  %v237_v11 = vld [vmem:[%s858_s2 + $0x28] sm:$0xff]  ;;  %v236_v15 = vld [vmem:[%s858_s2 + $0x20] sm:$0xff]  ;;  %v234_v26 = vld [vmem:[%s858_s2 + $0x10] sm:$0xff] }
  0x17   : > { %524 = vmatprep.subr.mxu0 %v230_v1  ;;  %539 = vmatprep.subr.mxu1 %v230_v1  ;;  %s213_s7 = scalar_lea.vmem %s856_s0, %s510_s4  ;;  %v238_v27 = vld [vmem:[%s858_s2 + $0x30] sm:$0xff] }
  0x18   : > { %525 = vmatpush3.msra.mxu0 %v230_v1  ;;  %541 = vmatpush3.msra.mxu1 %v230_v1  ;;  %v222_v2 = vld [vmem:[%s213_s7] sm:$0xff]  ;;  %v223_v4 = vld [vmem:[%s213_s7 + $0x8] sm:$0xff]  ;;  %v224_v6 = vld [vmem:[%s213_s7 + $0x10] sm:$0xff] }
  0x19   : > { %v226_v3 = vld [vmem:[%s213_s7 + $0x20] sm:$0xff]  ;;  %526 = vmatprep.mubr.msk.f32.mxu0 %vm240_vm0, %v222_v2  ;;  %v227_v5 = vld [vmem:[%s213_s7 + $0x28] sm:$0xff]  ;;  %v228_v7 = vld [vmem:[%s213_s7 + $0x30] sm:$0xff] }
  0x1a   : > { %532 = vmatprep.mubr.msk.f32.mxu1 %vm240_vm0, %v226_v3  ;;  %527 = vmatmul.mubr.msk.f32.vlgmr.msra.gmra.mxu0 %vm240_vm0, %v223_v4  ;;  %v225_v8 = vld [vmem:[%s213_s7 + $0x18] sm:$0xff] }
  0x1b   : > { %533 = vmatmul.mubr.msk.f32.vlgmr.msra.gmra.mxu1 %vm240_vm0, %v227_v5  ;;  %529 = vmatprep.mubr.msk.f32.mxu0 %vm240_vm0, %v224_v6  ;;  %v229_v9 = vld [vmem:[%s213_s7 + $0x38] sm:$0xff]  ;;  %s394_s7 = sshll.u32 %s204_s5, 4  ;;  %s807_s7 = int_to_ptr.vmem [resolvable:$true] %s394_s7 }
  0x1c   : > { %535 = vmatprep.mubr.msk.f32.mxu1 %vm240_vm0, %v228_v7  ;;  %s599_s26 = scalar_lea.vmem %s807_s7, 1024  ;;  %p606_p1 = scmp.lt.s32.totalorder %s807_s7, %s604_s28 }
  0x1d   : > { %p600_p12 = scmp.ne.s32.totalorder %s807_s7, %s599_s26  ;;  %p607_p2 = scmp.lt.s32.totalorder %s605_s29, %s599_s26 }
  0x1e   : > { %530 = vmatmul.mubr.msk.f32.gmra.mxu0 %vm240_vm0, %v225_v8 }
  0x1f   : > { %536 = vmatmul.mubr.msk.f32.gmra.mxu1 %vm240_vm0, %v229_v9  ;;  %p601_p13 = pnand %p600_p12, %p740_p4  ;;  %p608_p3 = por %p607_p2, %p606_p1 }
  0x21   : > { %p602_p0 = pneg %p601_p13 }
  0x23   : > { %p609_p5 = pnand %p608_p3, %p602_p0 }
  0xda   : > { %v528_v12 = vpop.f32.mrf.mxu0 }
  0xdb   : > { %v534_v13 = vpop.f32.mrf.mxu1  ;;  %v337_v16 = vadd.f32 %v528_v12, %v233_v10 }
  0xdc   : > { %v357_v17 = vadd.f32 %v534_v13, %v237_v11  ;;  %v331_v18 = vpop.f32.mrf.mxu0 }
  0xdd   : > { %v351_v19 = vpop.f32.mrf.mxu1  ;;  %371 = vst [vmem:[%s204_s5 + $0x8] sm:$0xff] %v337_v16  ;;  %v332_v22 = vadd.f32 %v331_v18, %v232_v14 }
  0xde   : > { %375 = vst [vmem:[%s204_s5 + $0x28] sm:$0xff] %v357_v17  ;;  %v352_v23 = vadd.f32 %v351_v19, %v236_v15  ;;  %v531_v24 = vpop.f32.mrf.mxu0 }
  0xdf   : > { %v537_v25 = vpop.f32.mrf.mxu1  ;;  %370 = vst [vmem:[%s204_s5] sm:$0xff] %v332_v22  ;;  %v347_v28 = vadd.f32 %v531_v24, %v235_v20 }
  0xe0   : > { %374 = vst [vmem:[%s204_s5 + $0x20] sm:$0xff] %v352_v23  ;;  %v367_v29 = vadd.f32 %v537_v25, %v239_v21  ;;  %v341_v30 = vpop.f32.mrf.mxu0 }
  0xe1   : > { %v361_v31 = vpop.f32.mrf.mxu1  ;;  %373 = vst [vmem:[%s204_s5 + $0x18] sm:$0xff] %v347_v28  ;;  %v342_v32 = vadd.f32 %v341_v30, %v234_v26 }
  0xe2   : > { %377 = vst [vmem:[%s204_s5 + $0x38] sm:$0xff] %v367_v29  ;;  %v362_v33 = vadd.f32 %v361_v31, %v238_v27 }
  0xe3   : > { %372 = vst [vmem:[%s204_s5 + $0x10] sm:$0xff] %v342_v32 }
  0xe4   : > { %376 = vst [vmem:[%s204_s5 + $0x30] sm:$0xff] %v362_v33 }
  0xe5   : > { %612 = shalt.err (!%p609_p5)
}
  0xe6   : > { %s613_s8 = scalar_lea.hbm %s805_s21, 1024  ;;  %s617_s5 = scalar_lea.hbm %s859_s3, 2048 }
  0xe7   : > { %p614_p6 = scmp.ne.s32.totalorder %s805_s21, %s613_s8  ;;  %p618_p10 = scmp.lt.s32.totalorder %s805_s21, %s859_s3 }
  0xe8   : > { %p619_p11 = scmp.lt.s32.totalorder %s617_s5, %s613_s8 }
  0xe9   : > { %p615_p7 = pnand %p614_p6, %p740_p4 }
  0xea   : > { %p620_p12 = por %p619_p11, %p618_p10 }
  0xeb   : > { %p616_p9 = pneg %p615_p7 }
  0xed   : > { %p621_p13 = pnand %p620_p12, %p616_p9 }
  0xef   : > { %624 = shalt.err (!%p621_p13)
}
  0xf0   : > { %s678_s11 = smov 128   ;;  %s679_s18 = smov 8  }
  0xf1   : > { %542 = dma.vmem_to_hbm [thread:$0]  (%p740_p4), %s807_s7, 1024, %s805_s21, %s811_s23, %s678_s11, %s678_s11, %s679_s18  }
  0xf2 PF: > { %p548_p0 = scmp.ge.s32.totalorder %s675_s17, 2  ;;  %s409_s19 = sand.u32 1, %s655_s12  }
  0xf3   : > { %s410_s15 = scalar_lea.sflag [#allocation3], %s409_s19 }
  0xf4   : > { %p545_p1 = pnand %p548_p0, %p747_p8 }
  0xf6   : > { %p546_p2 = pneg %p545_p1 }
  0xf8   : > { %650 = dma.done.wait (%p546_p2), %s410_s15, 1024  }
  0xf9   : > { %652 = vsyncadd (%p546_p2), %s410_s15, 4294966272  ;;  %s16_s17 = sadd.s32 1, %s675_s17   ;;  %s862_s12 = smov %s659_s13 }
  0xfa   : > { %p13_p3 = scmp.ge.s32.totalorder %s16_s17, 4   ;;  %s863_s13 = smov %s663_s14 }
  0xfb   : > { %s864_s14 = smov %s753_s25  ;;  %s865_s15 = smov %s671_s16 }
  0xfc   : > { %s866_s16 = smov %s868_s20  ;;  %15 = sbr.rel (!%p13_p3) target bundleno = 4 (0x4), region = 70 }
 0x101   :  { %415 = vsyncpa [#allocation3], 1 }
 0x102   :  { %417 = vsyncpa [#allocation3 + $0x1], 1 }

</bundles_post_ra>
